<compile_context>
chip_gen: v5e
topology: v5e:2x2
jax: 0.10.0
libtpu: 0.0.40
codegen_flags: <defaults>
</compile_context>

<pallas_src>
import jax
import jax.numpy as jnp
from jax import lax
from jax.experimental import pallas as pl
from jax.experimental.pallas import tpu as pltpu

EPS = 1e-5          # torch.nn.BatchNorm2d default eps
MOMENTUM = 0.1      # torch.nn.BatchNorm2d default momentum


def bn_clamp_kernel(x_ref, o_ref, mean_ref, var_ref):
    # x_ref / o_ref: (C, M) f32 with M = N*H*W; mean_ref / var_ref: (C, 1) f32.
    # Whole-array block => Mosaic masks the lane padding (M=6 -> 128), so the
    # axis=1 reductions only see the logical 6 columns.  NOTE: this assumption
    # breaks if M is ever tiled with a partial last block — keep block == array.
    x = x_ref[...]
    m = x.shape[1]
    mean = jnp.sum(x, axis=1, keepdims=True) * (1.0 / m)            # (C, 1)
    xc = x - mean                                                    # pass 2
    ssd = jnp.sum(xc * xc, axis=1, keepdims=True)                    # (C, 1)
    var_biased = ssd * (1.0 / m)        # torch normalizes with the biased var
    inv_std = lax.rsqrt(var_biased + EPS)                            # (C, 1)
    # gamma=1, beta=0 (default affine init) folded out of the forward output.
    o_ref[...] = jnp.minimum(xc * inv_std, 5.0)
    mean_ref[...] = mean
    var_ref[...] = ssd * (1.0 / max(m - 1, 1))    # unbiased, for running_var


def batchnorm_clamp(x_nchw, running_mean=None, running_var=None,
                    momentum=MOMENTUM):
    """Training-mode BatchNorm2d + clamp_max(5).

    x_nchw: (N, C, H, W) float32.
    If running_mean/running_var (shape (C,)) are given, also returns the
    updated running stats (functional equivalent of the torch buffer update).
    """
    n, c, h, w = x_nchw.shape
    m = n * h * w
    x_nchw = x_nchw.astype(jnp.float32)
    if n == 1:
        x2d = x_nchw.reshape(c, m)                  # free reshape, no transpose
    else:
        # General-N fallback (not exercised by the spec's (1,256,2,3) input).
        x2d = jnp.moveaxis(x_nchw, 1, 0).reshape(c, m)

    vmem = pltpu.MemorySpace.VMEM
    out2d, mean_c1, var_unb_c1 = pl.pallas_call(
        bn_clamp_kernel,
        out_shape=(
            jax.ShapeDtypeStruct((c, m), jnp.float32),
            jax.ShapeDtypeStruct((c, 1), jnp.float32),
            jax.ShapeDtypeStruct((c, 1), jnp.float32),
        ),
        in_specs=[pl.BlockSpec(memory_space=vmem)],
        out_specs=(
            pl.BlockSpec(memory_space=vmem),
            pl.BlockSpec(memory_space=vmem),
            pl.BlockSpec(memory_space=vmem),
        ),
    )(x2d)

    if n == 1:
        out = out2d.reshape(n, c, h, w)
    else:
        out = jnp.moveaxis(out2d.reshape(c, n, h, w), 0, 1)

    if running_mean is None or running_var is None:
        return out

    # torch: running_mean <- (1-mom)*rm + mom*batch_mean
    #        running_var  <- (1-mom)*rv + mom*unbiased_batch_var
    new_rm = (1.0 - momentum) * running_mean + momentum * mean_c1[:, 0]
    new_rv = (1.0 - momentum) * running_var + momentum * var_unb_c1[:, 0]
    return out, new_rm, new_rv


if __name__ == "__main__":
    key = jax.random.PRNGKey(0)
    # Shapes implied by the module: x = torch.randn(1, 256, 2, 3)
    N, C, H, W = 1, 256, 2, 3
    M = N * H * W
    x = jax.random.normal(key, (N, C, H, W), dtype=jnp.float32)
    running_mean = jnp.zeros((C,), jnp.float32)   # torch buffer init
    running_var = jnp.ones((C,), jnp.float32)     # torch buffer init

    out, new_rm, new_rv = batchnorm_clamp(x, running_mean, running_var)
    out, new_rm, new_rv = jax.block_until_ready((out, new_rm, new_rv))

    # ---- plain-JAX reference (torch training-mode semantics) ----
    mean = jnp.mean(x, axis=(0, 2, 3))                               # (C,)
    var_b = jnp.mean((x - mean[None, :, None, None]) ** 2, axis=(0, 2, 3))
    ref = jnp.minimum(
        (x - mean[None, :, None, None])
        / jnp.sqrt(var_b[None, :, None, None] + EPS),
        5.0,
    )
    var_unb = var_b * M / (M - 1)
    ref_rm = (1.0 - MOMENTUM) * running_mean + MOMENTUM * mean
    ref_rv = (1.0 - MOMENTUM) * running_var + MOMENTUM * var_unb

    assert out.shape == (N, C, H, W)
    assert jnp.max(jnp.abs(out - ref)) < 1e-4
    assert jnp.max(jnp.abs(new_rm - ref_rm)) < 1e-4
    assert jnp.max(jnp.abs(new_rv - ref_rv)) < 1e-4

    # TODO(synk): in-place mutation of the torch module's running buffers has
    # no JAX equivalent; the updated stats are returned functionally instead.

    print("KERNEL_OK")
</pallas_src>

<mosaic_0001>
module attributes {stable_mosaic.version = 11 : i64} {
  func.func @bn_clamp_kernel(%arg0: memref<256x6xf32, #tpu.memory_space<vmem>>, %arg1: memref<256x6xf32, #tpu.memory_space<vmem>>, %arg2: memref<256x1xf32, #tpu.memory_space<vmem>>, %arg3: memref<256x1xf32, #tpu.memory_space<vmem>>) attributes {dimension_semantics = [], scalar_prefetch = 0 : i64, scratch_operands = 0 : i64, tpu.core_type = #tpu.core_type<tc>} {
    %c0 = arith.constant 0 : index
    %c0_0 = arith.constant 0 : index
    %0 = vector.load %arg0[%c0, %c0_0] : memref<256x6xf32, #tpu.memory_space<vmem>>, vector<256x6xf32>
    %cst = arith.constant dense<0.000000e+00> : vector<256xf32>
    %1 = vector.multi_reduction <add>, %0, %cst [1] : vector<256x6xf32> to vector<256xf32>
    %2 = vector.shape_cast %1 : vector<256xf32> to vector<256x1xf32>
    %cst_1 = arith.constant 0.166666672 : f32
    %3 = vector.broadcast %cst_1 : f32 to vector<256x1xf32>
    %4 = arith.mulf %2, %3 : vector<256x1xf32>
    %5 = vector.broadcast %4 : vector<256x1xf32> to vector<256x6xf32>
    %6 = arith.subf %0, %5 : vector<256x6xf32>
    %7 = arith.mulf %6, %6 : vector<256x6xf32>
    %cst_2 = arith.constant dense<0.000000e+00> : vector<256xf32>
    %8 = vector.multi_reduction <add>, %7, %cst_2 [1] : vector<256x6xf32> to vector<256xf32>
    %9 = vector.shape_cast %8 : vector<256xf32> to vector<256x1xf32>
    %cst_3 = arith.constant 0.166666672 : f32
    %10 = vector.broadcast %cst_3 : f32 to vector<256x1xf32>
    %11 = arith.mulf %9, %10 : vector<256x1xf32>
    %cst_4 = arith.constant 9.99999974E-6 : f32
    %12 = vector.broadcast %cst_4 : f32 to vector<256x1xf32>
    %13 = arith.addf %11, %12 : vector<256x1xf32>
    %14 = math.rsqrt %13 : vector<256x1xf32>
    %15 = vector.broadcast %14 : vector<256x1xf32> to vector<256x6xf32>
    %16 = arith.mulf %6, %15 : vector<256x6xf32>
    %cst_5 = arith.constant 5.000000e+00 : f32
    %17 = vector.broadcast %cst_5 : f32 to vector<256x6xf32>
    %18 = arith.minimumf %16, %17 : vector<256x6xf32>
    %c0_6 = arith.constant 0 : index
    %c0_7 = arith.constant 0 : index
    %19 = vector.load %arg1[%c0_6, %c0_7] : memref<256x6xf32, #tpu.memory_space<vmem>>, vector<256x6xf32>
    tpu.vector_store %arg1[%c0_6, %c0_7], %18 {strides = array<i32>} : memref<256x6xf32, #tpu.memory_space<vmem>>, vector<256x6xf32>,
    %c0_8 = arith.constant 0 : index
    %c0_9 = arith.constant 0 : index
    %20 = vector.load %arg2[%c0_8, %c0_9] : memref<256x1xf32, #tpu.memory_space<vmem>>, vector<256x1xf32>
    tpu.vector_store %arg2[%c0_8, %c0_9], %4 {strides = array<i32>} : memref<256x1xf32, #tpu.memory_space<vmem>>, vector<256x1xf32>,
    %cst_10 = arith.constant 2.000000e-01 : f32
    %21 = vector.broadcast %cst_10 : f32 to vector<256x1xf32>
    %22 = arith.mulf %9, %21 : vector<256x1xf32>
    %c0_11 = arith.constant 0 : index
    %c0_12 = arith.constant 0 : index
    %23 = vector.load %arg3[%c0_11, %c0_12] : memref<256x1xf32, #tpu.memory_space<vmem>>, vector<256x1xf32>
    tpu.vector_store %arg3[%c0_11, %c0_12], %22 {strides = array<i32>} : memref<256x1xf32, #tpu.memory_space<vmem>>, vector<256x1xf32>,
    return
  }
}

</mosaic_0001>

<bundles_post_ra>
// kernel: tpu_custom_call.1
= control target key start
LH: loop header
LB: loop body
LE: loop exit
PB: predicated region body
PF: predicated region fallthrough
CT: control target
= control target key end

     0   :  { %vm43_vm0 = vcmask 48128   ;;  %vm812_vm1 = vcmask 7168   ;;  %s2277_s0 = inlined_call_operand.vmem [shape: f32[256,6], index: 0, kind: input, shape index: {}]   ;;  %s2278_s2 = inlined_call_operand.vmem [shape: f32[256,1], index: 2, kind: output, shape index: {1}]   ;;  %s2279_s3 = inlined_call_operand.vmem [shape: f32[256,1], index: 3, kind: output, shape index: {2}]   ;;  %s2280_s1 = inlined_call_operand.vmem [shape: f32[256,6], index: 1, kind: output, shape index: {0}]  }
   0x1   :  { %v1008_v0 = vld [vmem:[%s2277_s0 + $0x20] sm:$0xff]  ;;  %v1013_v1 = vld [vmem:[%s2277_s0 + $0x10] sm:$0xff]  ;;  %v1029_v6 = vld [vmem:[%s2277_s0 + $0x28] sm:$0xff] }
   0x2   :  { %v1018_v2 = vld [vmem:[%s2277_s0] sm:$0xff]  ;;  %v56_v3 = vsel %vm43_vm0, %v1008_v0, 0.0  ;;  %v50_v4 = vsel %vm43_vm0, %v1013_v1, 0.0  ;;  %v1034_v7 = vld [vmem:[%s2277_s0 + $0x18] sm:$0xff]  ;;  %v1039_v8 = vld [vmem:[%s2277_s0 + $0x8] sm:$0xff]  ;;  %v59_v9 = vsel %vm43_vm0, %v1029_v6, 0.0 }
   0x3   :  { %v44_v5 = vsel %vm43_vm0, %v1018_v2, 0.0  ;;  %57 = vadd.xlane.f32.xlu2 %v56_v3  ;;  %51 = vadd.xlane.f32.xlu1 %v50_v4  ;;  %v53_v10 = vsel %vm43_vm0, %v1034_v7, 0.0  ;;  %v47_v11 = vsel %vm43_vm0, %v1039_v8, 0.0  ;;  %v1050_v12 = vld [vmem:[%s2277_s0 + $0x40] sm:$0xff]  ;;  %v1055_v13 = vld [vmem:[%s2277_s0 + $0x38] sm:$0xff]  ;;  %v1060_v14 = vld [vmem:[%s2277_s0 + $0x30] sm:$0xff] }
   0x4   :  { %45 = vadd.xlane.f32.xlu0 %v44_v5  ;;  %v68_v15 = vsel %vm43_vm0, %v1050_v12, 0.0  ;;  %v65_v16 = vsel %vm43_vm0, %v1055_v13, 0.0  ;;  %v62_v17 = vsel %vm43_vm0, %v1060_v14, 0.0  ;;  %v1071_v18 = vld [vmem:[%s2277_s0 + $0x58] sm:$0xff]  ;;  %v1076_v19 = vld [vmem:[%s2277_s0 + $0x50] sm:$0xff]  ;;  %v1081_v20 = vld [vmem:[%s2277_s0 + $0x48] sm:$0xff] }
   0x5   :  { %v77_v21 = vsel %vm43_vm0, %v1071_v18, 0.0  ;;  %v74_v22 = vsel %vm43_vm0, %v1076_v19, 0.0  ;;  %v71_v23 = vsel %vm43_vm0, %v1081_v20, 0.0  ;;  %v1092_v24 = vld [vmem:[%s2277_s0 + $0x70] sm:$0xff]  ;;  %v1097_v25 = vld [vmem:[%s2277_s0 + $0x68] sm:$0xff]  ;;  %v1102_v26 = vld [vmem:[%s2277_s0 + $0x60] sm:$0xff] }
   0x6   :  { %v86_v27 = vsel %vm43_vm0, %v1092_v24, 0.0  ;;  %v83_v28 = vsel %vm43_vm0, %v1097_v25, 0.0  ;;  %v80_v29 = vsel %vm43_vm0, %v1102_v26, 0.0  ;;  %v1113_v30 = vld [vmem:[%s2277_s0 + $0x88] sm:$0xff]  ;;  %v1118_v31 = vld [vmem:[%s2277_s0 + $0x80] sm:$0xff]  ;;  %v1123_v32 = vld [vmem:[%s2277_s0 + $0x78] sm:$0xff] }
   0x7   :  { %v95_v33 = vsel %vm43_vm0, %v1113_v30, 0.0  ;;  %v92_v34 = vsel %vm43_vm0, %v1118_v31, 0.0  ;;  %v89_v35 = vsel %vm43_vm0, %v1123_v32, 0.0  ;;  %v1134_v36 = vld [vmem:[%s2277_s0 + $0xa0] sm:$0xff]  ;;  %v1139_v37 = vld [vmem:[%s2277_s0 + $0x98] sm:$0xff]  ;;  %v1144_v38 = vld [vmem:[%s2277_s0 + $0x90] sm:$0xff] }
   0x8   :  { %v104_v39 = vsel %vm43_vm0, %v1134_v36, 0.0  ;;  %v101_v40 = vsel %vm43_vm0, %v1139_v37, 0.0  ;;  %v98_v41 = vsel %vm43_vm0, %v1144_v38, 0.0  ;;  %v1155_v42 = vld [vmem:[%s2277_s0 + $0xb8] sm:$0xff]  ;;  %v1160_v43 = vld [vmem:[%s2277_s0 + $0xb0] sm:$0xff]  ;;  %v1165_v44 = vld [vmem:[%s2277_s0 + $0xa8] sm:$0xff] }
   0x9   :  { %v113_v45 = vsel %vm43_vm0, %v1155_v42, 0.0  ;;  %v110_v46 = vsel %vm43_vm0, %v1160_v43, 0.0  ;;  %v107_v47 = vsel %vm43_vm0, %v1165_v44, 0.0  ;;  %v1176_v48 = vld [vmem:[%s2277_s0 + $0xd0] sm:$0xff]  ;;  %v1181_v49 = vld [vmem:[%s2277_s0 + $0xc8] sm:$0xff]  ;;  %v1186_v50 = vld [vmem:[%s2277_s0 + $0xc0] sm:$0xff] }
   0xa   :  { %v122_v51 = vsel %vm43_vm0, %v1176_v48, 0.0  ;;  %v119_v52 = vsel %vm43_vm0, %v1181_v49, 0.0  ;;  %v116_v53 = vsel %vm43_vm0, %v1186_v50, 0.0  ;;  %v1197_v54 = vld [vmem:[%s2277_s0 + $0xe8] sm:$0xff]  ;;  %v1202_v55 = vld [vmem:[%s2277_s0 + $0xe0] sm:$0xff]  ;;  %v1207_v56 = vld [vmem:[%s2277_s0 + $0xd8] sm:$0xff] }
   0xb   :  { %60 = vadd.xlane.f32.xlu2 %v59_v9  ;;  %54 = vadd.xlane.f32.xlu1 %v53_v10  ;;  %v131_v57 = vsel %vm43_vm0, %v1197_v54, 0.0  ;;  %v128_v58 = vsel %vm43_vm0, %v1202_v55, 0.0  ;;  %v125_v59 = vsel %vm43_vm0, %v1207_v56, 0.0  ;;  %v1218_v60 = vld [vmem:[%s2277_s0 + $0xf8] sm:$0xff]  ;;  %v1223_v61 = vld [vmem:[%s2277_s0 + $0xf0] sm:$0xff] }
   0xc   :  { %48 = vadd.xlane.f32.xlu0 %v47_v11  ;;  %v137_v62 = vsel %vm43_vm0, %v1218_v60, 0.0  ;;  %v134_v63 = vsel %vm43_vm0, %v1223_v61, 0.0 }
  0x13   :  { %69 = vadd.xlane.f32.xlu2 %v68_v15  ;;  %66 = vadd.xlane.f32.xlu1 %v65_v16 }
  0x14   :  { %63 = vadd.xlane.f32.xlu0 %v62_v17 }
  0x1b   :  { %78 = vadd.xlane.f32.xlu2 %v77_v21  ;;  %75 = vadd.xlane.f32.xlu1 %v74_v22 }
  0x1c   :  { %72 = vadd.xlane.f32.xlu0 %v71_v23 }
  0x23   :  { %87 = vadd.xlane.f32.xlu2 %v86_v27  ;;  %84 = vadd.xlane.f32.xlu1 %v83_v28 }
  0x24   :  { %81 = vadd.xlane.f32.xlu0 %v80_v29 }
  0x2b   :  { %96 = vadd.xlane.f32.xlu2 %v95_v33  ;;  %93 = vadd.xlane.f32.xlu1 %v92_v34 }
  0x2c   :  { %90 = vadd.xlane.f32.xlu0 %v89_v35 }
  0x33   :  { %105 = vadd.xlane.f32.xlu2 %v104_v39  ;;  %102 = vadd.xlane.f32.xlu1 %v101_v40 }
  0x34   :  { %99 = vadd.xlane.f32.xlu0 %v98_v41 }
  0x3b   :  { %114 = vadd.xlane.f32.xlu2 %v113_v45  ;;  %111 = vadd.xlane.f32.xlu1 %v110_v46 }
  0x3c   :  { %108 = vadd.xlane.f32.xlu0 %v107_v47 }
  0x43   :  { %123 = vadd.xlane.f32.xlu2 %v122_v51  ;;  %120 = vadd.xlane.f32.xlu1 %v119_v52 }
  0x44   :  { %117 = vadd.xlane.f32.xlu0 %v116_v53 }
  0x4b   :  { %132 = vadd.xlane.f32.xlu2 %v131_v57  ;;  %129 = vadd.xlane.f32.xlu1 %v128_v58 }
  0x4c   :  { %126 = vadd.xlane.f32.xlu0 %v125_v59 }
  0x53   :  { %138 = vadd.xlane.f32.xlu1 %v137_v62 }
  0x54   :  { %135 = vadd.xlane.f32.xlu0 %v134_v63 }
  0x76   :  { %v58_v3 = vpop.xlane.xlu2 %57  ;;  %v52_v4 = vpop.xlane.xlu1 %51 }
  0x77   :  { %v144_v5 = vmul.f32 0.16666667, %v58_v3  ;;  %v142_v9 = vmul.f32 0.16666667, %v52_v4  ;;  %v46_v10 = vpop.xlane.xlu0 %45 }
  0x78   :  { %v140_v11 = vmul.f32 0.16666667, %v46_v10 }
  0x79   :  { %817 = vst.msk [vmem:[%s2278_s2 + $0x20] sm:$0xff] %vm812_vm1, %v144_v5  ;;  %v1234_v15 = vsub.f32 %v1013_v1, %v142_v9  ;;  %v1279_v40 = vsub.f32 %v1008_v0, %v144_v5 }
  0x7a   :  { %815 = vst.msk [vmem:[%s2278_s2 + $0x10] sm:$0xff] %vm812_vm1, %v142_v9  ;;  %v1241_v16 = vsub.f32 %v1018_v2, %v140_v11 }
  0x7b   :  { %813 = vst.msk [vmem:[%s2278_s2] sm:$0xff] %vm812_vm1, %v140_v11  ;;  %v206_v17 = vmul.f32 %v1234_v15, %v1234_v15  ;;  %v208_v0 = vmul.f32 %v1279_v40, %v1279_v40 }
  0x7c   :  { %v204_v1 = vmul.f32 %v1241_v16, %v1241_v16 }
  0x7d   :  { %v242_v21 = vsel %vm43_vm0, %v206_v17, 0.0  ;;  %v248_v3 = vsel %vm43_vm0, %v208_v0, 0.0 }
  0x7e   :  { %v61_v22 = vpop.xlane.xlu2 %60  ;;  %243 = vadd.xlane.f32.xlu1 %v242_v21  ;;  %v55_v23 = vpop.xlane.xlu1 %54  ;;  %v236_v27 = vsel %vm43_vm0, %v204_v1, 0.0 }
  0x7f   :  { %v145_v2 = vmul.f32 0.16666667, %v61_v22  ;;  %v143_v28 = vmul.f32 0.16666667, %v55_v23  ;;  %237 = vadd.xlane.f32.xlu2 %v236_v27  ;;  %v49_v29 = vpop.xlane.xlu0 %48 }
  0x80   :  { %v141_v33 = vmul.f32 0.16666667, %v49_v29 }
  0x81   :  { %v1254_v34 = vsub.f32 %v1029_v6, %v145_v2  ;;  %818 = vst.msk [vmem:[%s2278_s2 + $0x28] sm:$0xff] %vm812_vm1, %v145_v2  ;;  %v1261_v35 = vsub.f32 %v1034_v7, %v143_v28 }
  0x82   :  { %816 = vst.msk [vmem:[%s2278_s2 + $0x18] sm:$0xff] %vm812_vm1, %v143_v28  ;;  %v1268_v39 = vsub.f32 %v1039_v8, %v141_v33 }
  0x83   :  { %814 = vst.msk [vmem:[%s2278_s2 + $0x8] sm:$0xff] %vm812_vm1, %v141_v33  ;;  %v209_v6 = vmul.f32 %v1254_v34, %v1254_v34  ;;  %v207_v7 = vmul.f32 %v1261_v35, %v1261_v35 }
  0x84   :  { %v205_v41 = vmul.f32 %v1268_v39, %v1268_v39 }
  0x85   :  { %v251_v8 = vsel %vm43_vm0, %v209_v6, 0.0  ;;  %v245_v45 = vsel %vm43_vm0, %v207_v7, 0.0 }
  0x86   :  { %v70_v46 = vpop.xlane.xlu2 %69  ;;  %252 = vadd.xlane.f32.xlu1 %v251_v8  ;;  %v239_v47 = vsel %vm43_vm0, %v205_v41, 0.0  ;;  %v67_v51 = vpop.xlane.xlu1 %66 }
  0x87   :  { %v148_v52 = vmul.f32 0.16666667, %v70_v46  ;;  %246 = vadd.xlane.f32.xlu2 %v245_v45  ;;  %240 = vadd.xlane.f32.xlu0 %v239_v47  ;;  %v64_v53 = vpop.xlane.xlu0 %63  ;;  %v147_v57 = vmul.f32 0.16666667, %v67_v51 }
  0x88   :  { %v146_v58 = vmul.f32 0.16666667, %v64_v53 }
  0x89   :  { %v1289_v59 = vsub.f32 %v1050_v12, %v148_v52  ;;  %821 = vst.msk [vmem:[%s2278_s2 + $0x40] sm:$0xff] %vm812_vm1, %v148_v52  ;;  %v1309_v12 = vsub.f32 %v1055_v13, %v147_v57 }
  0x8a   :  { %v1296_v62 = vsub.f32 %v1060_v14, %v146_v58  ;;  %819 = vst.msk [vmem:[%s2278_s2 + $0x30] sm:$0xff] %vm812_vm1, %v146_v58 }
  0x8b   :  { %v212_v63 = vmul.f32 %v1289_v59, %v1289_v59  ;;  %820 = vst.msk [vmem:[%s2278_s2 + $0x38] sm:$0xff] %vm812_vm1, %v147_v57  ;;  %v211_v13 = vmul.f32 %v1309_v12, %v1309_v12 }
  0x8c   :  { %v210_v14 = vmul.f32 %v1296_v62, %v1296_v62 }
  0x8d   :  { %v260_v4 = vsel %vm43_vm0, %v212_v63, 0.0  ;;  %v257_v2 = vsel %vm43_vm0, %v211_v13, 0.0 }
  0x8e   :  { %v79_v5 = vpop.xlane.xlu2 %78  ;;  %261 = vadd.xlane.f32.xlu1 %v260_v4  ;;  %v254_v9 = vsel %vm43_vm0, %v210_v14, 0.0  ;;  %v76_v10 = vpop.xlane.xlu1 %75 }
  0x8f   :  { %v151_v11 = vmul.f32 0.16666667, %v79_v5  ;;  %249 = vadd.xlane.f32.xlu0 %v248_v3  ;;  %255 = vadd.xlane.f32.xlu2 %v254_v9  ;;  %v73_v17 = vpop.xlane.xlu0 %72  ;;  %v150_v1 = vmul.f32 0.16666667, %v76_v10 }
  0x90   :  { %v149_v21 = vmul.f32 0.16666667, %v73_v17 }
  0x91   :  { %v1319_v22 = vsub.f32 %v1071_v18, %v151_v11  ;;  %824 = vst.msk [vmem:[%s2278_s2 + $0x58] sm:$0xff] %vm812_vm1, %v151_v11  ;;  %v1339_v18 = vsub.f32 %v1076_v19, %v150_v1 }
  0x92   :  { %v1326_v23 = vsub.f32 %v1081_v20, %v149_v21  ;;  %822 = vst.msk [vmem:[%s2278_s2 + $0x48] sm:$0xff] %vm812_vm1, %v149_v21 }
  0x93   :  { %v215_v27 = vmul.f32 %v1319_v22, %v1319_v22  ;;  %823 = vst.msk [vmem:[%s2278_s2 + $0x50] sm:$0xff] %vm812_vm1, %v150_v1  ;;  %v214_v19 = vmul.f32 %v1339_v18, %v1339_v18 }
  0x94   :  { %v213_v20 = vmul.f32 %v1326_v23, %v1326_v23 }
  0x95   :  { %v269_v28 = vsel %vm43_vm0, %v215_v27, 0.0  ;;  %v266_v52 = vsel %vm43_vm0, %v214_v19, 0.0 }
  0x96   :  { %v88_v29 = vpop.xlane.xlu2 %87  ;;  %270 = vadd.xlane.f32.xlu1 %v269_v28  ;;  %v263_v33 = vsel %vm43_vm0, %v213_v20, 0.0  ;;  %v85_v6 = vpop.xlane.xlu1 %84 }
  0x97   :  { %v154_v7 = vmul.f32 0.16666667, %v88_v29  ;;  %258 = vadd.xlane.f32.xlu0 %v257_v2  ;;  %264 = vadd.xlane.f32.xlu2 %v263_v33  ;;  %v82_v41 = vpop.xlane.xlu0 %81  ;;  %v153_v8 = vmul.f32 0.16666667, %v85_v6 }
  0x98   :  { %v152_v45 = vmul.f32 0.16666667, %v82_v41 }
  0x99   :  { %v1349_v46 = vsub.f32 %v1092_v24, %v154_v7  ;;  %827 = vst.msk [vmem:[%s2278_s2 + $0x70] sm:$0xff] %vm812_vm1, %v154_v7  ;;  %v1369_v24 = vsub.f32 %v1097_v25, %v153_v8 }
  0x9a   :  { %v1356_v47 = vsub.f32 %v1102_v26, %v152_v45  ;;  %825 = vst.msk [vmem:[%s2278_s2 + $0x60] sm:$0xff] %vm812_vm1, %v152_v45 }
  0x9b   :  { %v218_v51 = vmul.f32 %v1349_v46, %v1349_v46  ;;  %826 = vst.msk [vmem:[%s2278_s2 + $0x68] sm:$0xff] %vm812_vm1, %v153_v8  ;;  %v217_v25 = vmul.f32 %v1369_v24, %v1369_v24 }
  0x9c   :  { %v216_v26 = vmul.f32 %v1356_v47, %v1356_v47 }
  0x9d   :  { %v278_v53 = vsel %vm43_vm0, %v218_v51, 0.0  ;;  %v275_v11 = vsel %vm43_vm0, %v217_v25, 0.0 }
  0x9e   :  { %v97_v57 = vpop.xlane.xlu2 %96  ;;  %279 = vadd.xlane.f32.xlu1 %v278_v53  ;;  %v272_v58 = vsel %vm43_vm0, %v216_v26, 0.0  ;;  %v94_v0 = vpop.xlane.xlu1 %93 }
  0x9f   :  { %v157_v63 = vmul.f32 0.16666667, %v97_v57  ;;  %267 = vadd.xlane.f32.xlu0 %v266_v52  ;;  %273 = vadd.xlane.f32.xlu2 %v272_v58  ;;  %v91_v3 = vpop.xlane.xlu0 %90  ;;  %v156_v14 = vmul.f32 0.16666667, %v94_v0 }
  0xa0   :  { %v155_v4 = vmul.f32 0.16666667, %v91_v3 }
  0xa1   :  { %v1379_v5 = vsub.f32 %v1113_v30, %v157_v63  ;;  %830 = vst.msk [vmem:[%s2278_s2 + $0x88] sm:$0xff] %vm812_vm1, %v157_v63  ;;  %v1399_v30 = vsub.f32 %v1118_v31, %v156_v14 }
  0xa2   :  { %v1386_v9 = vsub.f32 %v1123_v32, %v155_v4  ;;  %828 = vst.msk [vmem:[%s2278_s2 + $0x78] sm:$0xff] %vm812_vm1, %v155_v4 }
  0xa3   :  { %v221_v10 = vmul.f32 %v1379_v5, %v1379_v5  ;;  %829 = vst.msk [vmem:[%s2278_s2 + $0x80] sm:$0xff] %vm812_vm1, %v156_v14  ;;  %v220_v31 = vmul.f32 %v1399_v30, %v1399_v30 }
  0xa4   :  { %v219_v32 = vmul.f32 %v1386_v9, %v1386_v9 }
  0xa5   :  { %v287_v17 = vsel %vm43_vm0, %v221_v10, 0.0  ;;  %v284_v7 = vsel %vm43_vm0, %v220_v31, 0.0 }
  0xa6   :  { %v106_v1 = vpop.xlane.xlu2 %105  ;;  %288 = vadd.xlane.f32.xlu1 %v287_v17  ;;  %v281_v21 = vsel %vm43_vm0, %v219_v32, 0.0  ;;  %v103_v13 = vpop.xlane.xlu1 %102 }
  0xa7   :  { %v160_v27 = vmul.f32 0.16666667, %v106_v1  ;;  %276 = vadd.xlane.f32.xlu0 %v275_v11  ;;  %282 = vadd.xlane.f32.xlu2 %v281_v21  ;;  %v100_v2 = vpop.xlane.xlu0 %99  ;;  %v159_v20 = vmul.f32 0.16666667, %v103_v13 }
  0xa8   :  { %v158_v28 = vmul.f32 0.16666667, %v100_v2 }
  0xa9   :  { %v1409_v29 = vsub.f32 %v1134_v36, %v160_v27  ;;  %833 = vst.msk [vmem:[%s2278_s2 + $0xa0] sm:$0xff] %vm812_vm1, %v160_v27  ;;  %v1429_v36 = vsub.f32 %v1139_v37, %v159_v20 }
  0xaa   :  { %v1416_v33 = vsub.f32 %v1144_v38, %v158_v28  ;;  %831 = vst.msk [vmem:[%s2278_s2 + $0x90] sm:$0xff] %vm812_vm1, %v158_v28 }
  0xab   :  { %v224_v6 = vmul.f32 %v1409_v29, %v1409_v29  ;;  %832 = vst.msk [vmem:[%s2278_s2 + $0x98] sm:$0xff] %vm812_vm1, %v159_v20  ;;  %v223_v37 = vmul.f32 %v1429_v36, %v1429_v36 }
  0xac   :  { %v222_v38 = vmul.f32 %v1416_v33, %v1416_v33 }
  0xad   :  { %v296_v41 = vsel %vm43_vm0, %v224_v6, 0.0  ;;  %v293_v63 = vsel %vm43_vm0, %v223_v37, 0.0 }
  0xae   :  { %v115_v8 = vpop.xlane.xlu2 %114  ;;  %297 = vadd.xlane.f32.xlu1 %v296_v41  ;;  %v290_v45 = vsel %vm43_vm0, %v222_v38, 0.0  ;;  %v112_v19 = vpop.xlane.xlu1 %111 }
  0xaf   :  { %v163_v51 = vmul.f32 0.16666667, %v115_v8  ;;  %285 = vadd.xlane.f32.xlu0 %v284_v7  ;;  %291 = vadd.xlane.f32.xlu2 %v290_v45  ;;  %v109_v52 = vpop.xlane.xlu0 %108  ;;  %v162_v26 = vmul.f32 0.16666667, %v112_v19 }
  0xb0   :  { %v161_v53 = vmul.f32 0.16666667, %v109_v52 }
  0xb1   :  { %v1439_v57 = vsub.f32 %v1155_v42, %v163_v51  ;;  %836 = vst.msk [vmem:[%s2278_s2 + $0xb8] sm:$0xff] %vm812_vm1, %v163_v51  ;;  %v1459_v42 = vsub.f32 %v1160_v43, %v162_v26 }
  0xb2   :  { %v1446_v58 = vsub.f32 %v1165_v44, %v161_v53  ;;  %834 = vst.msk [vmem:[%s2278_s2 + $0xa8] sm:$0xff] %vm812_vm1, %v161_v53 }
  0xb3   :  { %v227_v0 = vmul.f32 %v1439_v57, %v1439_v57  ;;  %835 = vst.msk [vmem:[%s2278_s2 + $0xb0] sm:$0xff] %vm812_vm1, %v162_v26  ;;  %v226_v43 = vmul.f32 %v1459_v42, %v1459_v42 }
  0xb4   :  { %v225_v44 = vmul.f32 %v1446_v58, %v1446_v58 }
  0xb5   :  { %v305_v3 = vsel %vm43_vm0, %v227_v0, 0.0  ;;  %v302_v27 = vsel %vm43_vm0, %v226_v43, 0.0 }
  0xb6   :  { %v124_v14 = vpop.xlane.xlu2 %123  ;;  %306 = vadd.xlane.f32.xlu1 %v305_v3  ;;  %v299_v4 = vsel %vm43_vm0, %v225_v44, 0.0  ;;  %v121_v25 = vpop.xlane.xlu1 %120 }
  0xb7   :  { %v166_v10 = vmul.f32 0.16666667, %v124_v14  ;;  %294 = vadd.xlane.f32.xlu0 %v293_v63  ;;  %300 = vadd.xlane.f32.xlu2 %v299_v4  ;;  %v118_v11 = vpop.xlane.xlu0 %117  ;;  %v165_v32 = vmul.f32 0.16666667, %v121_v25 }
  0xb8   :  { %v164_v17 = vmul.f32 0.16666667, %v118_v11 }
  0xb9   :  { %v1469_v1 = vsub.f32 %v1176_v48, %v166_v10  ;;  %839 = vst.msk [vmem:[%s2278_s2 + $0xd0] sm:$0xff] %vm812_vm1, %v166_v10  ;;  %v1489_v48 = vsub.f32 %v1181_v49, %v165_v32 }
  0xba   :  { %v1476_v21 = vsub.f32 %v1186_v50, %v164_v17  ;;  %837 = vst.msk [vmem:[%s2278_s2 + $0xc0] sm:$0xff] %vm812_vm1, %v164_v17 }
  0xbb   :  { %v230_v13 = vmul.f32 %v1469_v1, %v1469_v1  ;;  %838 = vst.msk [vmem:[%s2278_s2 + $0xc8] sm:$0xff] %vm812_vm1, %v165_v32  ;;  %v229_v49 = vmul.f32 %v1489_v48, %v1489_v48 }
  0xbc   :  { %v228_v50 = vmul.f32 %v1476_v21, %v1476_v21 }
  0xbd   :  { %v314_v2 = vsel %vm43_vm0, %v230_v13, 0.0  ;;  %v311_v51 = vsel %vm43_vm0, %v229_v49, 0.0 }
  0xbe   :  { %v133_v20 = vpop.xlane.xlu2 %132  ;;  %315 = vadd.xlane.f32.xlu1 %v314_v2  ;;  %v308_v28 = vsel %vm43_vm0, %v228_v50, 0.0  ;;  %v130_v31 = vpop.xlane.xlu1 %129 }
  0xbf   :  { %v169_v6 = vmul.f32 0.16666667, %v133_v20  ;;  %303 = vadd.xlane.f32.xlu0 %v302_v27  ;;  %309 = vadd.xlane.f32.xlu2 %v308_v28  ;;  %v127_v7 = vpop.xlane.xlu0 %126  ;;  %v168_v38 = vmul.f32 0.16666667, %v130_v31 }
  0xc0   :  { %v167_v41 = vmul.f32 0.16666667, %v127_v7 }
  0xc1   :  { %v1499_v8 = vsub.f32 %v1197_v54, %v169_v6  ;;  %842 = vst.msk [vmem:[%s2278_s2 + $0xe8] sm:$0xff] %vm812_vm1, %v169_v6  ;;  %v1519_v54 = vsub.f32 %v1202_v55, %v168_v38 }
  0xc2   :  { %v1506_v45 = vsub.f32 %v1207_v56, %v167_v41  ;;  %840 = vst.msk [vmem:[%s2278_s2 + $0xd8] sm:$0xff] %vm812_vm1, %v167_v41 }
  0xc3   :  { %v233_v19 = vmul.f32 %v1499_v8, %v1499_v8  ;;  %841 = vst.msk [vmem:[%s2278_s2 + $0xe0] sm:$0xff] %vm812_vm1, %v168_v38  ;;  %v232_v55 = vmul.f32 %v1519_v54, %v1519_v54 }
  0xc4   :  { %v231_v56 = vmul.f32 %v1506_v45, %v1506_v45 }
  0xc5   :  { %v323_v52 = vsel %vm43_vm0, %v233_v19, 0.0  ;;  %v320_v14 = vsel %vm43_vm0, %v232_v55, 0.0 }
  0xc6   :  { %324 = vadd.xlane.f32.xlu1 %v323_v52  ;;  %v317_v26 = vsel %vm43_vm0, %v231_v56, 0.0  ;;  %v139_v53 = vpop.xlane.xlu1 %138 }
  0xc7   :  { %312 = vadd.xlane.f32.xlu0 %v311_v51  ;;  %318 = vadd.xlane.f32.xlu2 %v317_v26  ;;  %v136_v37 = vpop.xlane.xlu0 %135  ;;  %v171_v0 = vmul.f32 0.16666667, %v139_v53 }
  0xc8   :  { %v170_v63 = vmul.f32 0.16666667, %v136_v37 }
  0xc9   :  { %844 = vst.msk [vmem:[%s2278_s2 + $0xf8] sm:$0xff] %vm812_vm1, %v171_v0  ;;  %v1540_v3 = vsub.f32 %v1218_v60, %v171_v0 }
  0xca   :  { %v1533_v44 = vsub.f32 %v1223_v61, %v170_v63  ;;  %843 = vst.msk [vmem:[%s2278_s2 + $0xf0] sm:$0xff] %vm812_vm1, %v170_v63 }
  0xcb   :  { %v235_v61 = vmul.f32 %v1540_v3, %v1540_v3 }
  0xcc   :  { %v234_v4 = vmul.f32 %v1533_v44, %v1533_v44 }
  0xcd   :  { %v329_v10 = vsel %vm43_vm0, %v235_v61, 0.0 }
  0xce   :  { %v326_v25 = vsel %vm43_vm0, %v234_v4, 0.0 }
  0xcf   :  { %321 = vadd.xlane.f32.xlu0 %v320_v14  ;;  %327 = vadd.xlane.f32.xlu2 %v326_v25 }
  0xd7   :  { %330 = vadd.xlane.f32.xlu0 %v329_v10 }
  0xf1   :  { %v244_v11 = vpop.xlane.xlu1 %243 }
  0xf2   :  { %v334_v32 = vmul.f32 0.16666667, %v244_v11  ;;  %v847_v17 = vmul.f32 0.2, %v244_v11  ;;  %v238_v60 = vpop.xlane.xlu2 %237 }
  0xf3   :  { %v332_v43 = vmul.f32 0.16666667, %v238_v60  ;;  %v845_v13 = vmul.f32 0.2, %v238_v60 }
  0xf4   :  { %v366_v27 = vadd.f32 1e-05, %v334_v32  ;;  %879 = vst.msk [vmem:[%s2279_s3 + $0x10] sm:$0xff] %vm812_vm1, %v847_v17 }
  0xf5   :  { %v364_v50 = vadd.f32 1e-05, %v332_v43  ;;  %877 = vst.msk [vmem:[%s2279_s3] sm:$0xff] %vm812_vm1, %v845_v13 }
  0xf6   :  { %921 = vrsqrt.f32 %v366_v27  ;;  %vm422_vm2 = vweird.f32 %v366_v27 }
  0xf7   :  { %923 = vrsqrt.f32 %v364_v50  ;;  %vm402_vm4 = vweird.f32 %v364_v50 }
  0xf9   :  { %v253_v2 = vpop.xlane.xlu1 %252 }
  0xfa   :  { %v337_v20 = vmul.f32 0.16666667, %v253_v2  ;;  %v850_v28 = vmul.f32 0.2, %v253_v2  ;;  %v247_v31 = vpop.xlane.xlu2 %246  ;;  %v241_v6 = vpop.xlane.xlu0 %240 }
  0xfb   :  { %v335_v7 = vmul.f32 0.16666667, %v247_v31  ;;  %v848_v38 = vmul.f32 0.2, %v247_v31  ;;  %v333_v41 = vmul.f32 0.16666667, %v241_v6 }
  0xfc   :  { %v922_v49 = vpop.eup %921  ;;  %v1557_v19 = vadd.f32 1e-05, %v337_v20  ;;  %882 = vst.msk [vmem:[%s2279_s3 + $0x28] sm:$0xff] %vm812_vm1, %v850_v28  ;;  %v846_v51 = vmul.f32 0.2, %v241_v6 }
  0xfd   :  { %v924_v56 = vpop.eup %923  ;;  %v417_v52 = vmul.f32 %v922_v49, %v366_v27  ;;  %v1563_v26 = vadd.f32 1e-05, %v335_v7  ;;  %880 = vst.msk [vmem:[%s2279_s3 + $0x18] sm:$0xff] %vm812_vm1, %v848_v38  ;;  %v1569_v53 = vadd.f32 1e-05, %v333_v41  ;;  %vm423_vm3 = vweird.f32 %v922_v49 }
  0xfe   :  { %v397_v37 = vmul.f32 %v924_v56, %v364_v50  ;;  %925 = vrsqrt.f32 %v1557_v19  ;;  %878 = vst.msk [vmem:[%s2279_s3 + $0x8] sm:$0xff] %vm812_vm1, %v846_v51  ;;  %vm403_vm5 = vweird.f32 %v924_v56  ;;  %vm452_vm6 = vweird.f32 %v1557_v19  ;;  %vm424_vm7 = vmor %vm422_vm2, %vm423_vm3 }
  0xff   :  { %v418_v0 = vmul.f32 %v922_v49, %v417_v52  ;;  %927 = vrsqrt.f32 %v1563_v26  ;;  %vm404_vm8 = vmor %vm402_vm4, %vm403_vm5  ;;  %vm432_vm9 = vweird.f32 %v1563_v26  ;;  %vm412_vm11 = vweird.f32 %v1569_v53 }
 0x100   :  { %v398_v63 = vmul.f32 %v924_v56, %v397_v37  ;;  %929 = vrsqrt.f32 %v1569_v53 }
 0x101   :  { %v419_v55 = vmul.f32 0.5, %v418_v0  ;;  %v262_v14 = vpop.xlane.xlu1 %261 }
 0x102   :  { %v399_v4 = vmul.f32 0.5, %v398_v63  ;;  %v340_v25 = vmul.f32 0.16666667, %v262_v14  ;;  %v853_v61 = vmul.f32 0.2, %v262_v14  ;;  %v256_v10 = vpop.xlane.xlu2 %255  ;;  %v250_v60 = vpop.xlane.xlu0 %249 }
 0x103   :  { %v420_v11 = vsub.f32 1.5, %v419_v55  ;;  %v338_v32 = vmul.f32 0.16666667, %v256_v10  ;;  %v851_v17 = vmul.f32 0.2, %v256_v10 }
 0x104   :  { %v1578_v43 = vpop.eup %925  ;;  %v400_v13 = vsub.f32 1.5, %v399_v4  ;;  %v1580_v2 = vadd.f32 1e-05, %v340_v25  ;;  %885 = vst.msk [vmem:[%s2279_s3 + $0x40] sm:$0xff] %vm812_vm1, %v853_v61  ;;  %v336_v51 = vmul.f32 0.16666667, %v250_v60 }
 0x105   :  { %v1586_v20 = vpop.eup %927  ;;  %v421_v28 = vmul.f32 %v922_v49, %v420_v11  ;;  %v447_v31 = vmul.f32 %v1578_v43, %v1557_v19  ;;  %v1591_v6 = vadd.f32 1e-05, %v338_v32  ;;  %883 = vst.msk [vmem:[%s2279_s3 + $0x30] sm:$0xff] %vm812_vm1, %v851_v17  ;;  %vm453_vm10 = vweird.f32 %v1578_v43 }
 0x106   :  { %v1597_v7 = vpop.eup %929  ;;  %v401_v38 = vmul.f32 %v924_v56, %v400_v13  ;;  %v427_v41 = vmul.f32 %v1586_v20, %v1563_v26  ;;  %931 = vrsqrt.f32 %v1580_v2  ;;  %v1617_v10 = vadd.f32 1e-05, %v336_v51  ;;  %vm1629_vm12 = vmor %vm452_vm6, %vm453_vm10 }
 0x107   :  { %v425_v52 = vsel %vm424_vm7, %v922_v49, %v421_v28  ;;  %v448_v37 = vmul.f32 %v1578_v43, %v447_v31  ;;  %v407_v0 = vmul.f32 %v1597_v7, %v1569_v53  ;;  %933 = vrsqrt.f32 %v1591_v6 }
 0x108   :  { %v718_v27 = vmul.f32 %v425_v52, %v1234_v15  ;;  %v405_v63 = vsel %vm404_vm8, %v924_v56, %v401_v38  ;;  %v428_v55 = vmul.f32 %v1586_v20, %v427_v41  ;;  %v849_v32 = vmul.f32 0.2, %v250_v60 }
 0x109   :  { %v716_v14 = vmul.f32 %v405_v63, %v1241_v16  ;;  %v449_v49 = vmul.f32 0.5, %v448_v37  ;;  %v408_v50 = vmul.f32 %v1597_v7, %v407_v0  ;;  %v271_v4 = vpop.xlane.xlu1 %270  ;;  %vm433_vm13 = vweird.f32 %v1586_v20 }
 0x10a   :  { %v750_v25 = vmin.f32 %v718_v27, 5.0  ;;  %v429_v61 = vmul.f32 0.5, %v428_v55  ;;  %935 = vrsqrt.f32 %v1617_v10  ;;  %v343_v60 = vmul.f32 0.16666667, %v271_v4  ;;  %v265_v38 = vpop.xlane.xlu2 %264  ;;  %v259_v41 = vpop.xlane.xlu0 %258  ;;  %881 = vst.msk [vmem:[%s2279_s3 + $0x20] sm:$0xff] %vm812_vm1, %v849_v32  ;;  %vm434_vm2 = vmor %vm432_vm9, %vm433_vm13 }
 0x10b   :  { %v748_v15 = vmin.f32 %v716_v14, 5.0  ;;  %v450_v56 = vsub.f32 1.5, %v449_v49  ;;  %v409_v11 = vmul.f32 0.5, %v408_v50  ;;  %vm413_vm14 = vweird.f32 %v1597_v7 }
 0x10c   :  { %v1619_v17 = vpop.eup %931  ;;  %782 = vst.msk [vmem:[%s2280_s1 + $0x10] sm:$0xff] %vm43_vm0, %v750_v25  ;;  %v430_v13 = vsub.f32 1.5, %v429_v61  ;;  %vm482_vm15 = vweird.f32 %v1580_v2  ;;  %v1649_v52 = vadd.f32 1e-05, %v343_v60  ;;  %v856_v37 = vmul.f32 0.2, %v271_v4  ;;  %vm414_vm4 = vmor %vm412_vm11, %vm413_vm14 }
 0x10d   :  { %780 = vst.msk [vmem:[%s2280_s1] sm:$0xff] %vm43_vm0, %v748_v15  ;;  %v451_v28 = vmul.f32 %v1578_v43, %v450_v56  ;;  %v410_v31 = vsub.f32 1.5, %v409_v11  ;;  %v477_v19 = vmul.f32 %v1619_v17, %v1580_v2  ;;  %v1651_v0 = vpop.eup %933  ;;  %vm483_vm3 = vweird.f32 %v1619_v17 }
 0x10e   :  { %v431_v51 = vmul.f32 %v1586_v20, %v430_v13  ;;  %888 = vst.msk [vmem:[%s2279_s3 + $0x58] sm:$0xff] %vm812_vm1, %v856_v37  ;;  %v341_v26 = vmul.f32 0.16666667, %v265_v38  ;;  %937 = vrsqrt.f32 %v1649_v52  ;;  %vm1692_vm5 = vmor %vm482_vm15, %vm483_vm3  ;;  %vm462_vm6 = vweird.f32 %v1591_v6 }
 0x10f   :  { %v455_v27 = vsel %vm1629_vm12, %v1578_v43, %v451_v28  ;;  %v411_v63 = vmul.f32 %v1597_v7, %v410_v31  ;;  %v478_v55 = vmul.f32 %v1619_v17, %v477_v19  ;;  %v457_v43 = vmul.f32 %v1651_v0, %v1591_v6 }
 0x110   :  { %v721_v14 = vmul.f32 %v455_v27, %v1254_v34  ;;  %v435_v49 = vsel %vm434_vm2, %v1586_v20, %v431_v51  ;;  %v1678_v20 = vpop.eup %935  ;;  %v1697_v16 = vadd.f32 1e-05, %v341_v26  ;;  %v854_v28 = vmul.f32 0.2, %v265_v38 }
 0x111   :  { %v719_v50 = vmul.f32 %v435_v49, %v1261_v35  ;;  %v415_v34 = vsel %vm414_vm4, %v1597_v7, %v411_v63  ;;  %v479_v4 = vmul.f32 0.5, %v478_v55  ;;  %v458_v61 = vmul.f32 %v1651_v0, %v457_v43  ;;  %v280_v32 = vpop.xlane.xlu1 %279 }
 0x112   :  { %v753_v53 = vmin.f32 %v721_v14, 5.0  ;;  %v717_v25 = vmul.f32 %v415_v34, %v1268_v39  ;;  %v437_v11 = vmul.f32 %v1678_v20, %v1617_v10  ;;  %v339_v2 = vmul.f32 0.16666667, %v259_v41  ;;  %886 = vst.msk [vmem:[%s2279_s3 + $0x48] sm:$0xff] %vm812_vm1, %v854_v28  ;;  %v268_v55 = vpop.xlane.xlu0 %267 }
 0x113   :  { %v751_v15 = vmin.f32 %v719_v50, 5.0  ;;  %v480_v56 = vsub.f32 1.5, %v479_v4  ;;  %v459_v7 = vmul.f32 0.5, %v458_v61  ;;  %vm463_vm7 = vweird.f32 %v1651_v0 }
 0x114   :  { %785 = vst.msk [vmem:[%s2280_s1 + $0x28] sm:$0xff] %vm43_vm0, %v753_v53  ;;  %v749_v35 = vmin.f32 %v717_v25, 5.0  ;;  %v438_v60 = vmul.f32 %v1678_v20, %v437_v11  ;;  %939 = vrsqrt.f32 %v1697_v16  ;;  %v852_v19 = vmul.f32 0.2, %v259_v41  ;;  %v1711_v51 = vpop.eup %937  ;;  %vm464_vm9 = vmor %vm462_vm6, %vm463_vm7 }
 0x115   :  { %783 = vst.msk [vmem:[%s2280_s1 + $0x18] sm:$0xff] %vm43_vm0, %v751_v15  ;;  %v481_v13 = vmul.f32 %v1619_v17, %v480_v56  ;;  %v460_v31 = vsub.f32 1.5, %v459_v7  ;;  %v1720_v38 = vadd.f32 1e-05, %v339_v2  ;;  %v346_v63 = vmul.f32 0.16666667, %v280_v32 }
 0x116   :  { %781 = vst.msk [vmem:[%s2280_s1 + $0x8] sm:$0xff] %vm43_vm0, %v749_v35  ;;  %v439_v27 = vmul.f32 0.5, %v438_v60  ;;  %vm442_vm8 = vweird.f32 %v1617_v10  ;;  %v507_v49 = vmul.f32 %v1711_v51, %v1649_v52  ;;  %vm443_vm10 = vweird.f32 %v1678_v20 }
 0x117   :  { %v485_v37 = vsel %vm1692_vm5, %v1619_v17, %v481_v13  ;;  %v461_v41 = vmul.f32 %v1651_v0, %v460_v31  ;;  %884 = vst.msk [vmem:[%s2279_s3 + $0x38] sm:$0xff] %vm812_vm1, %v852_v19  ;;  %v274_v17 = vpop.xlane.xlu2 %273  ;;  %941 = vrsqrt.f32 %v1720_v38  ;;  %v859_v4 = vmul.f32 0.2, %v280_v32  ;;  %vm444_vm12 = vmor %vm442_vm8, %vm443_vm10 }
 0x118   :  { %v724_v14 = vmul.f32 %v485_v37, %v1289_v59  ;;  %v440_v43 = vsub.f32 1.5, %v439_v27  ;;  %v1737_v59 = vadd.f32 1e-05, %v346_v63  ;;  %v508_v34 = vmul.f32 %v1711_v51, %v507_v49 }
 0x119   :  { %v465_v50 = vsel %vm464_vm9, %v1651_v0, %v461_v41  ;;  %vm512_vm11 = vweird.f32 %v1649_v52  ;;  %vm513_vm13 = vweird.f32 %v1711_v51  ;;  %v857_v61 = vmul.f32 0.2, %v274_v17  ;;  %891 = vst.msk [vmem:[%s2279_s3 + $0x70] sm:$0xff] %vm812_vm1, %v859_v4  ;;  %v289_v32 = vpop.xlane.xlu1 %288 }
 0x11a   :  { %v756_v26 = vmin.f32 %v724_v14, 5.0  ;;  %v722_v53 = vmul.f32 %v465_v50, %v1296_v62  ;;  %v441_v25 = vmul.f32 %v1678_v20, %v440_v43  ;;  %943 = vrsqrt.f32 %v1737_v59  ;;  %v1745_v6 = vpop.eup %939  ;;  %vm1778_vm14 = vmor %vm512_vm11, %vm513_vm13  ;;  %v277_v63 = vpop.xlane.xlu0 %276 }
 0x11b   :  { %v509_v0 = vmul.f32 0.5, %v508_v34  ;;  %v344_v62 = vmul.f32 0.16666667, %v274_v17  ;;  %v487_v11 = vmul.f32 %v1745_v6, %v1697_v16  ;;  %889 = vst.msk [vmem:[%s2279_s3 + $0x60] sm:$0xff] %vm812_vm1, %v857_v61  ;;  %vm492_vm15 = vweird.f32 %v1697_v16 }
 0x11c   :  { %788 = vst.msk [vmem:[%s2280_s1 + $0x40] sm:$0xff] %vm43_vm0, %v756_v26  ;;  %v754_v15 = vmin.f32 %v722_v53, 5.0  ;;  %v445_v56 = vsel %vm444_vm12, %v1678_v20, %v441_v25  ;;  %v342_v20 = vmul.f32 0.16666667, %v268_v55  ;;  %v855_v60 = vmul.f32 0.2, %v268_v55 }
 0x11d   :  { %v720_v10 = vmul.f32 %v445_v56, %v1279_v40  ;;  %v510_v35 = vsub.f32 1.5, %v509_v0  ;;  %v1762_v39 = vadd.f32 1e-05, %v344_v62  ;;  %v1768_v7 = vpop.eup %941  ;;  %v488_v13 = vmul.f32 %v1745_v6, %v487_v11 }
 0x11e   :  { %786 = vst.msk [vmem:[%s2280_s1 + $0x30] sm:$0xff] %vm43_vm0, %v754_v15  ;;  %v467_v31 = vmul.f32 %v1768_v7, %v1720_v38  ;;  %v349_v19 = vmul.f32 0.16666667, %v289_v32  ;;  %vm542_vm2 = vweird.f32 %v1737_v59  ;;  %v1791_v52 = vadd.f32 1e-05, %v342_v20 }
 0x11f   :  { %v752_v28 = vmin.f32 %v720_v10, 5.0  ;;  %v511_v2 = vmul.f32 %v1711_v51, %v510_v35  ;;  %v489_v27 = vmul.f32 0.5, %v488_v13  ;;  %945 = vrsqrt.f32 %v1762_v39  ;;  %887 = vst.msk [vmem:[%s2279_s3 + $0x50] sm:$0xff] %vm812_vm1, %v855_v60  ;;  %v283_v49 = vpop.xlane.xlu2 %282 }
 0x120   :  { %v1787_v37 = vpop.eup %943  ;;  %vm493_vm3 = vweird.f32 %v1745_v6  ;;  %v468_v14 = vmul.f32 %v1768_v7, %v467_v31  ;;  %vm473_vm4 = vweird.f32 %v1768_v7  ;;  %947 = vrsqrt.f32 %v1791_v52 }
 0x121   :  { %784 = vst.msk [vmem:[%s2280_s1 + $0x20] sm:$0xff] %vm43_vm0, %v752_v28  ;;  %v515_v55 = vsel %vm1778_vm14, %v1711_v51, %v511_v2  ;;  %v537_v41 = vmul.f32 %v1787_v37, %v1737_v59  ;;  %v490_v43 = vsub.f32 1.5, %v489_v27  ;;  %v1812_v34 = vadd.f32 1e-05, %v349_v19  ;;  %vm494_vm5 = vmor %vm492_vm15, %vm493_vm3  ;;  %v298_v28 = vpop.xlane.xlu1 %297 }
 0x122   :  { %v727_v17 = vmul.f32 %v515_v55, %v1319_v22  ;;  %v469_v26 = vmul.f32 0.5, %v468_v14  ;;  %v862_v51 = vmul.f32 0.2, %v289_v32  ;;  %v347_v25 = vmul.f32 0.16666667, %v283_v49  ;;  %v286_v31 = vpop.xlane.xlu0 %285 }
 0x123   :  { %v538_v50 = vmul.f32 %v1787_v37, %v537_v41  ;;  %v491_v53 = vmul.f32 %v1745_v6, %v490_v43  ;;  %v860_v0 = vmul.f32 0.2, %v283_v49  ;;  %vm543_vm6 = vweird.f32 %v1787_v37 }
 0x124   :  { %v759_v4 = vmin.f32 %v727_v17, 5.0  ;;  %v470_v22 = vsub.f32 1.5, %v469_v26  ;;  %949 = vrsqrt.f32 %v1812_v34  ;;  %894 = vst.msk [vmem:[%s2279_s3 + $0x88] sm:$0xff] %vm812_vm1, %v862_v51  ;;  %vm472_vm7 = vweird.f32 %v1720_v38  ;;  %vm1851_vm9 = vmor %vm542_vm2, %vm543_vm6 }
 0x125   :  { %v539_v62 = vmul.f32 0.5, %v538_v50  ;;  %v1825_v61 = vpop.eup %945  ;;  %v495_v16 = vsel %vm494_vm5, %v1745_v6, %v491_v53  ;;  %v1833_v15 = vadd.f32 1e-05, %v347_v25  ;;  %v345_v56 = vmul.f32 0.16666667, %v277_v63  ;;  %vm474_vm8 = vmor %vm472_vm7, %vm473_vm4  ;;  %892 = vst.msk [vmem:[%s2279_s3 + $0x78] sm:$0xff] %vm812_vm1, %v860_v0 }
 0x126   :  { %791 = vst.msk [vmem:[%s2280_s1 + $0x58] sm:$0xff] %vm43_vm0, %v759_v4  ;;  %v725_v11 = vmul.f32 %v495_v16, %v1326_v23  ;;  %v471_v32 = vmul.f32 %v1768_v7, %v470_v22  ;;  %v517_v35 = vmul.f32 %v1825_v61, %v1762_v39  ;;  %v1845_v38 = vpop.eup %947  ;;  %vm522_vm10 = vweird.f32 %v1762_v39 }
 0x127   :  { %v540_v10 = vsub.f32 1.5, %v539_v62  ;;  %951 = vrsqrt.f32 %v1833_v15  ;;  %v1856_v6 = vadd.f32 1e-05, %v345_v56  ;;  %v497_v59 = vmul.f32 %v1845_v38, %v1791_v52  ;;  %v292_v55 = vpop.xlane.xlu2 %291 }
 0x128   :  { %v757_v20 = vmin.f32 %v725_v11, 5.0  ;;  %v475_v40 = vsel %vm474_vm8, %v1768_v7, %v471_v32  ;;  %v518_v60 = vmul.f32 %v1825_v61, %v517_v35  ;;  %vm572_vm11 = vweird.f32 %v1812_v34 }
 0x129   :  { %v541_v13 = vmul.f32 %v1787_v37, %v540_v10  ;;  %v723_v2 = vmul.f32 %v475_v40, %v1309_v12  ;;  %953 = vrsqrt.f32 %v1856_v6  ;;  %v858_v27 = vmul.f32 0.2, %v277_v63 }
 0x12a   :  { %v1866_v19 = vpop.eup %949  ;;  %789 = vst.msk [vmem:[%s2280_s1 + $0x48] sm:$0xff] %vm43_vm0, %v757_v20  ;;  %v519_v12 = vmul.f32 0.5, %v518_v60  ;;  %v498_v49 = vmul.f32 %v1845_v38, %v497_v59  ;;  %vm523_vm12 = vweird.f32 %v1825_v61  ;;  %v865_v26 = vmul.f32 0.2, %v298_v28 }
 0x12b   :  { %v545_v7 = vsel %vm1851_vm9, %v1787_v37, %v541_v13  ;;  %v755_v14 = vmin.f32 %v723_v2, 5.0  ;;  %v567_v17 = vmul.f32 %v1866_v19, %v1812_v34  ;;  %890 = vst.msk [vmem:[%s2279_s3 + $0x68] sm:$0xff] %vm812_vm1, %v858_v27  ;;  %v352_v37 = vmul.f32 0.16666667, %v298_v28  ;;  %vm524_vm14 = vmor %vm522_vm10, %vm523_vm12  ;;  %v295_v34 = vpop.xlane.xlu0 %294 }
 0x12c   :  { %v730_v41 = vmul.f32 %v545_v7, %v1349_v46  ;;  %v520_v43 = vsub.f32 1.5, %v519_v12  ;;  %v499_v50 = vmul.f32 0.5, %v498_v49  ;;  %v350_v4 = vmul.f32 0.16666667, %v292_v55  ;;  %897 = vst.msk [vmem:[%s2279_s3 + $0xa0] sm:$0xff] %vm812_vm1, %v865_v26 }
 0x12d   :  { %v1885_v63 = vpop.eup %951  ;;  %787 = vst.msk [vmem:[%s2280_s1 + $0x38] sm:$0xff] %vm43_vm0, %v755_v14  ;;  %v568_v51 = vmul.f32 %v1866_v19, %v567_v17  ;;  %vm503_vm13 = vweird.f32 %v1845_v38  ;;  %v1896_v0 = vadd.f32 1e-05, %v352_v37  ;;  %vm573_vm15 = vweird.f32 %v1866_v19 }
 0x12e   :  { %v762_v46 = vmin.f32 %v730_v41, 5.0  ;;  %v521_v53 = vmul.f32 %v1825_v61, %v520_v43  ;;  %v547_v25 = vmul.f32 %v1885_v63, %v1833_v15  ;;  %v500_v62 = vsub.f32 1.5, %v499_v50  ;;  %vm1927_vm4 = vmor %vm572_vm11, %vm573_vm15 }
 0x12f   :  { %v1902_v22 = vpop.eup %953  ;;  %v569_v16 = vmul.f32 0.5, %v568_v51  ;;  %v1913_v56 = vadd.f32 1e-05, %v350_v4  ;;  %vm502_vm2 = vweird.f32 %v1791_v52  ;;  %955 = vrsqrt.f32 %v1896_v0  ;;  %v301_v14 = vpop.xlane.xlu2 %300 }
 0x130   :  { %794 = vst.msk [vmem:[%s2280_s1 + $0x70] sm:$0xff] %vm43_vm0, %v762_v46  ;;  %v525_v11 = vsel %vm524_vm14, %v1825_v61, %v521_v53  ;;  %v548_v32 = vmul.f32 %v1885_v63, %v547_v25  ;;  %v527_v10 = vmul.f32 %v1902_v22, %v1856_v6  ;;  %v501_v39 = vmul.f32 %v1845_v38, %v500_v62  ;;  %vm504_vm3 = vmor %vm502_vm2, %vm503_vm13 }
 0x131   :  { %v728_v35 = vmul.f32 %v525_v11, %v1356_v47  ;;  %v570_v23 = vsub.f32 1.5, %v569_v16  ;;  %vm552_vm5 = vweird.f32 %v1833_v15  ;;  %957 = vrsqrt.f32 %v1913_v56  ;;  %v307_v47 = vpop.xlane.xlu1 %306 }
 0x132   :  { %v549_v52 = vmul.f32 0.5, %v548_v32  ;;  %v528_v20 = vmul.f32 %v1902_v22, %v527_v10  ;;  %v505_v13 = vsel %vm504_vm3, %v1845_v38, %v501_v39  ;;  %vm553_vm6 = vweird.f32 %v1885_v63 }
 0x133   :  { %v760_v40 = vmin.f32 %v728_v35, 5.0  ;;  %v571_v60 = vmul.f32 %v1866_v19, %v570_v23  ;;  %v726_v28 = vmul.f32 %v505_v13, %v1339_v18  ;;  %v863_v7 = vmul.f32 0.2, %v292_v55  ;;  %vm554_vm8 = vmor %vm552_vm5, %vm553_vm6  ;;  %v304_v10 = vpop.xlane.xlu0 %303 }
 0x134   :  { %v550_v2 = vsub.f32 1.5, %v549_v52  ;;  %v529_v59 = vmul.f32 0.5, %v528_v20  ;;  %vm533_vm7 = vweird.f32 %v1902_v22  ;;  %v348_v38 = vmul.f32 0.16666667, %v286_v31 }
 0x135   :  { %792 = vst.msk [vmem:[%s2280_s1 + $0x60] sm:$0xff] %vm43_vm0, %v760_v40  ;;  %v575_v12 = vsel %vm1927_vm4, %v1866_v19, %v571_v60  ;;  %v861_v27 = vmul.f32 0.2, %v286_v31  ;;  %v758_v41 = vmin.f32 %v726_v28, 5.0  ;;  %v956_v17 = vpop.eup %955  ;;  %vm532_vm9 = vweird.f32 %v1856_v6 }
 0x136   :  { %v733_v18 = vmul.f32 %v575_v12, %v1379_v5  ;;  %v551_v49 = vmul.f32 %v1885_v63, %v550_v2  ;;  %v530_v55 = vsub.f32 1.5, %v529_v59  ;;  %895 = vst.msk [vmem:[%s2279_s3 + $0x90] sm:$0xff] %vm812_vm1, %v863_v7  ;;  %v1957_v31 = vadd.f32 1e-05, %v348_v38  ;;  %vm534_vm10 = vmor %vm532_vm9, %vm533_vm7 }
 0x137   :  { %893 = vst.msk [vmem:[%s2279_s3 + $0x80] sm:$0xff] %vm812_vm1, %v861_v27  ;;  %v355_v5 = vmul.f32 0.16666667, %v307_v47  ;;  %v958_v19 = vpop.eup %957  ;;  %v597_v6 = vmul.f32 %v956_v17, %v1896_v0  ;;  %vm602_vm11 = vweird.f32 %v1896_v0  ;;  %vm603_vm12 = vweird.f32 %v956_v17 }
 0x138   :  { %790 = vst.msk [vmem:[%s2280_s1 + $0x50] sm:$0xff] %vm43_vm0, %v758_v41  ;;  %v765_v43 = vmin.f32 %v733_v18, 5.0  ;;  %v555_v15 = vsel %vm554_vm8, %v1885_v63, %v551_v49  ;;  %v531_v37 = vmul.f32 %v1902_v22, %v530_v55  ;;  %v577_v46 = vmul.f32 %v958_v19, %v1913_v56  ;;  %vm2003_vm14 = vmor %vm602_vm11, %vm603_vm12 }
 0x139   :  { %v731_v26 = vmul.f32 %v555_v15, %v1386_v9  ;;  %v598_v51 = vmul.f32 %v956_v17, %v597_v6  ;;  %959 = vrsqrt.f32 %v1957_v31  ;;  %v1982_v53 = vadd.f32 1e-05, %v355_v5  ;;  %v316_v11 = vpop.xlane.xlu1 %315 }
 0x13a   :  { %797 = vst.msk [vmem:[%s2280_s1 + $0x88] sm:$0xff] %vm43_vm0, %v765_v43  ;;  %v535_v50 = vsel %vm534_vm10, %v1902_v22, %v531_v37  ;;  %v578_v4 = vmul.f32 %v958_v19, %v577_v46  ;;  %v868_v62 = vmul.f32 0.2, %v307_v47  ;;  %v353_v16 = vmul.f32 0.16666667, %v301_v14  ;;  %v310_v47 = vpop.xlane.xlu2 %309 }
 0x13b   :  { %v763_v63 = vmin.f32 %v731_v26, 5.0  ;;  %v729_v9 = vmul.f32 %v535_v50, %v1369_v24  ;;  %v599_v25 = vmul.f32 0.5, %v598_v51  ;;  %961 = vrsqrt.f32 %v1982_v53  ;;  %v2056_v26 = vpop.xlane.xlu0 %312 }
 0x13c   :  { %v579_v32 = vmul.f32 0.5, %v578_v4  ;;  %vm582_vm13 = vweird.f32 %v1913_v56  ;;  %900 = vst.msk [vmem:[%s2279_s3 + $0xb8] sm:$0xff] %vm812_vm1, %v868_v62  ;;  %v1994_v24 = vadd.f32 1e-05, %v353_v16  ;;  %v866_v39 = vmul.f32 0.2, %v301_v14 }
 0x13d   :  { %795 = vst.msk [vmem:[%s2280_s1 + $0x78] sm:$0xff] %vm43_vm0, %v763_v63  ;;  %v761_v22 = vmin.f32 %v729_v9, 5.0  ;;  %v600_v35 = vsub.f32 1.5, %v599_v25  ;;  %vm583_vm15 = vweird.f32 %v958_v19  ;;  %v351_v52 = vmul.f32 0.16666667, %v295_v34 }
 0x13e   :  { %v580_v61 = vsub.f32 1.5, %v579_v32  ;;  %v864_v20 = vmul.f32 0.2, %v295_v34  ;;  %963 = vrsqrt.f32 %v1994_v24  ;;  %898 = vst.msk [vmem:[%s2279_s3 + $0xa8] sm:$0xff] %vm812_vm1, %v866_v39  ;;  %v358_v0 = vmul.f32 0.16666667, %v316_v11  ;;  %vm584_vm2 = vmor %vm582_vm13, %vm583_vm15 }
 0x13f   :  { %793 = vst.msk [vmem:[%s2280_s1 + $0x68] sm:$0xff] %vm43_vm0, %v761_v22  ;;  %v2007_v40 = vpop.eup %959  ;;  %v601_v13 = vmul.f32 %v956_v17, %v600_v35  ;;  %v2016_v2 = vadd.f32 1e-05, %v351_v52  ;;  %v871_v7 = vmul.f32 0.2, %v316_v11  ;;  %vm562_vm3 = vweird.f32 %v1957_v31 }
 0x140   :  { %v581_v60 = vmul.f32 %v958_v19, %v580_v61  ;;  %v557_v28 = vmul.f32 %v2007_v40, %v1957_v31  ;;  %896 = vst.msk [vmem:[%s2279_s3 + $0x98] sm:$0xff] %vm812_vm1, %v864_v20  ;;  %v2026_v59 = vadd.f32 1e-05, %v358_v0  ;;  %v356_v12 = vmul.f32 0.16666667, %v310_v47 }
 0x141   :  { %v605_v34 = vsel %vm2003_vm14, %v956_v17, %v601_v13  ;;  %v2028_v38 = vpop.eup %961  ;;  %965 = vrsqrt.f32 %v2016_v2  ;;  %vm632_vm4 = vweird.f32 %v1982_v53  ;;  %903 = vst.msk [vmem:[%s2279_s3 + $0xd0] sm:$0xff] %vm812_vm1, %v871_v7  ;;  %vm612_vm5 = vweird.f32 %v1994_v24  ;;  %v325_v43 = vpop.xlane.xlu1 %324 }
 0x142   :  { %v736_v27 = vmul.f32 %v605_v34, %v1409_v29  ;;  %v585_v14 = vsel %vm584_vm2, %v958_v19, %v581_v60  ;;  %v558_v41 = vmul.f32 %v2007_v40, %v557_v28  ;;  %v627_v56 = vmul.f32 %v2028_v38, %v1982_v53  ;;  %v319_v62 = vpop.xlane.xlu2 %318 }
 0x143   :  { %v734_v18 = vmul.f32 %v585_v14, %v1416_v33  ;;  %967 = vrsqrt.f32 %v2026_v59  ;;  %v2047_v5 = vadd.f32 1e-05, %v356_v12  ;;  %v869_v19 = vmul.f32 0.2, %v310_v47 }
 0x144   :  { %v768_v29 = vmin.f32 %v736_v27, 5.0  ;;  %v559_v49 = vmul.f32 0.5, %v558_v41  ;;  %v2044_v55 = vpop.eup %963  ;;  %v628_v17 = vmul.f32 %v2028_v38, %v627_v56  ;;  %vm563_vm6 = vweird.f32 %v2007_v40  ;;  %v322_v56 = vpop.xlane.xlu0 %321 }
 0x145   :  { %v766_v33 = vmin.f32 %v734_v18, 5.0  ;;  %v607_v37 = vmul.f32 %v2044_v55, %v1994_v24  ;;  %v354_v6 = vmul.f32 0.16666667, %v304_v10  ;;  %vm633_vm7 = vweird.f32 %v2028_v38  ;;  %901 = vst.msk [vmem:[%s2279_s3 + $0xc0] sm:$0xff] %vm812_vm1, %v869_v19  ;;  %vm564_vm8 = vmor %vm562_vm3, %vm563_vm6 }
 0x146   :  { %800 = vst.msk [vmem:[%s2280_s1 + $0xa0] sm:$0xff] %vm43_vm0, %v768_v29  ;;  %v560_v15 = vsub.f32 1.5, %v559_v49  ;;  %v629_v46 = vmul.f32 0.5, %v628_v17  ;;  %969 = vrsqrt.f32 %v2047_v5  ;;  %v867_v50 = vmul.f32 0.2, %v304_v10  ;;  %vm2092_vm10 = vmor %vm632_vm4, %vm633_vm7 }
 0x147   :  { %798 = vst.msk [vmem:[%s2280_s1 + $0x90] sm:$0xff] %vm43_vm0, %v766_v33  ;;  %v2064_v51 = vpop.eup %965  ;;  %v608_v9 = vmul.f32 %v2044_v55, %v607_v37  ;;  %v2072_v4 = vadd.f32 1e-05, %v354_v6  ;;  %v361_v25 = vmul.f32 0.16666667, %v325_v43  ;;  %vm592_vm9 = vweird.f32 %v2016_v2 }
 0x148   :  { %v561_v63 = vmul.f32 %v2007_v40, %v560_v15  ;;  %v630_v16 = vsub.f32 1.5, %v629_v46  ;;  %v587_v11 = vmul.f32 %v2064_v51, %v2016_v2  ;;  %899 = vst.msk [vmem:[%s2279_s3 + $0xb0] sm:$0xff] %vm812_vm1, %v867_v50  ;;  %v874_v22 = vmul.f32 0.2, %v325_v43 }
 0x149   :  { %v2085_v32 = vpop.eup %967  ;;  %v609_v35 = vmul.f32 0.5, %v608_v9  ;;  %vm662_vm11 = vweird.f32 %v2026_v59  ;;  %971 = vrsqrt.f32 %v2072_v4  ;;  %vm613_vm12 = vweird.f32 %v2044_v55 }
 0x14a   :  { %v565_v10 = vsel %vm564_vm8, %v2007_v40, %v561_v63  ;;  %v631_v23 = vmul.f32 %v2028_v38, %v630_v16  ;;  %v588_v61 = vmul.f32 %v2064_v51, %v587_v11  ;;  %v657_v52 = vmul.f32 %v2085_v32, %v2026_v59  ;;  %906 = vst.msk [vmem:[%s2279_s3 + $0xe8] sm:$0xff] %vm812_vm1, %v874_v22  ;;  %vm614_vm14 = vmor %vm612_vm5, %vm613_vm12  ;;  %v328_v2 = vpop.xlane.xlu2 %327 }
 0x14b   :  { %v732_v39 = vmul.f32 %v565_v10, %v1399_v30  ;;  %v610_v53 = vsub.f32 1.5, %v609_v35  ;;  %v2108_v20 = vadd.f32 1e-05, %v361_v25  ;;  %v359_v47 = vmul.f32 0.16666667, %v319_v62 }
 0x14c   :  { %v2110_v40 = vpop.eup %969  ;;  %v635_v13 = vsel %vm2092_vm10, %v2028_v38, %v631_v23  ;;  %v589_v0 = vmul.f32 0.5, %v588_v61  ;;  %v658_v60 = vmul.f32 %v2085_v32, %v657_v52  ;;  %vm593_vm13 = vweird.f32 %v2064_v51 }
 0x14d   :  { %v764_v30 = vmin.f32 %v732_v39, 5.0  ;;  %v739_v28 = vmul.f32 %v635_v13, %v1439_v57  ;;  %v611_v34 = vmul.f32 %v2044_v55, %v610_v53  ;;  %v637_v7 = vmul.f32 %v2110_v40, %v2047_v5  ;;  %vm594_vm2 = vmor %vm592_vm9, %vm593_vm13 }
 0x14e   :  { %v590_v12 = vsub.f32 1.5, %v589_v0  ;;  %v659_v38 = vmul.f32 0.5, %v658_v60  ;;  %vm663_vm15 = vweird.f32 %v2085_v32  ;;  %973 = vrsqrt.f32 %v2108_v20 }
 0x14f   :  { %796 = vst.msk [vmem:[%s2280_s1 + $0x80] sm:$0xff] %vm43_vm0, %v764_v30  ;;  %v2129_v57 = vpop.eup %971  ;;  %v771_v27 = vmin.f32 %v739_v28, 5.0  ;;  %v615_v14 = vsel %vm614_vm14, %v2044_v55, %v611_v34  ;;  %v638_v41 = vmul.f32 %v2110_v40, %v637_v7  ;;  %v2133_v18 = vadd.f32 1e-05, %v359_v47  ;;  %vm2149_vm3 = vmor %vm662_vm11, %vm663_vm15 }
 0x150   :  { %v737_v29 = vmul.f32 %v615_v14, %v1446_v58  ;;  %v591_v24 = vmul.f32 %v2064_v51, %v590_v12  ;;  %v660_v49 = vsub.f32 1.5, %v659_v38  ;;  %v617_v33 = vmul.f32 %v2129_v57, %v2072_v4 }
 0x151   :  { %803 = vst.msk [vmem:[%s2280_s1 + $0xb8] sm:$0xff] %vm43_vm0, %v771_v27  ;;  %v639_v55 = vmul.f32 0.5, %v638_v41  ;;  %vm642_vm4 = vweird.f32 %v2047_v5  ;;  %vm643_vm5 = vweird.f32 %v2110_v40  ;;  %975 = vrsqrt.f32 %v2133_v18 }
 0x152   :  { %v769_v17 = vmin.f32 %v737_v29, 5.0  ;;  %v595_v19 = vsel %vm594_vm2, %v2064_v51, %v591_v24  ;;  %v661_v43 = vmul.f32 %v2085_v32, %v660_v49  ;;  %v618_v15 = vmul.f32 %v2129_v57, %v617_v33  ;;  %vm644_vm6 = vmor %vm642_vm4, %vm643_vm5 }
 0x153   :  { %v735_v59 = vmul.f32 %v595_v19, %v1429_v36  ;;  %v640_v37 = vsub.f32 1.5, %v639_v55  ;;  %v872_v6 = vmul.f32 0.2, %v319_v62  ;;  %v357_v46 = vmul.f32 0.16666667, %v2056_v26 }
 0x154   :  { %v2161_v50 = vpop.eup %973  ;;  %801 = vst.msk [vmem:[%s2280_s1 + $0xa8] sm:$0xff] %vm43_vm0, %v769_v17  ;;  %v665_v51 = vsel %vm2149_vm3, %v2085_v32, %v661_v43  ;;  %v619_v63 = vmul.f32 0.5, %v618_v15  ;;  %v870_v9 = vmul.f32 0.2, %v2056_v26  ;;  %v362_v25 = vmul.f32 0.16666667, %v328_v2 }
 0x155   :  { %v767_v36 = vmin.f32 %v735_v59, 5.0  ;;  %v742_v62 = vmul.f32 %v665_v51, %v1469_v1  ;;  %v641_v16 = vmul.f32 %v2110_v40, %v640_v37  ;;  %v687_v11 = vmul.f32 %v2161_v50, %v2108_v20  ;;  %904 = vst.msk [vmem:[%s2279_s3 + $0xd8] sm:$0xff] %vm812_vm1, %v872_v6 }
 0x156   :  { %v620_v26 = vsub.f32 1.5, %v619_v63  ;;  %vm623_vm7 = vweird.f32 %v2129_v57  ;;  %v2184_v22 = vadd.f32 1e-05, %v357_v46  ;;  %902 = vst.msk [vmem:[%s2279_s3 + $0xc8] sm:$0xff] %vm812_vm1, %v870_v9  ;;  %v2190_v1 = vadd.f32 1e-05, %v362_v25 }
 0x157   :  { %v976_v32 = vpop.eup %975  ;;  %799 = vst.msk [vmem:[%s2280_s1 + $0x98] sm:$0xff] %vm43_vm0, %v767_v36  ;;  %v774_v5 = vmin.f32 %v742_v62, 5.0  ;;  %v645_v10 = vsel %vm644_vm6, %v2110_v40, %v641_v16  ;;  %v688_v31 = vmul.f32 %v2161_v50, %v687_v11  ;;  %v875_v35 = vmul.f32 0.2, %v328_v2 }
 0x158   :  { %v740_v39 = vmul.f32 %v645_v10, %v1476_v21  ;;  %v621_v23 = vmul.f32 %v2129_v57, %v620_v26  ;;  %vm622_vm8 = vweird.f32 %v2072_v4  ;;  %v667_v61 = vmul.f32 %v976_v32, %v2133_v18  ;;  %v331_v21 = vpop.xlane.xlu0 %330 }
 0x159   :  { %806 = vst.msk [vmem:[%s2280_s1 + $0xd0] sm:$0xff] %vm43_vm0, %v774_v5  ;;  %vm624_vm9 = vmor %vm622_vm8, %vm623_vm7  ;;  %v689_v52 = vmul.f32 0.5, %v688_v31  ;;  %vm692_vm10 = vweird.f32 %v2108_v20  ;;  %vm693_vm11 = vweird.f32 %v2161_v50  ;;  %977 = vrsqrt.f32 %v2184_v22 }
 0x15a   :  { %v772_v53 = vmin.f32 %v740_v39, 5.0  ;;  %v625_v4 = vsel %vm624_vm9, %v2129_v57, %v621_v23  ;;  %v668_v47 = vmul.f32 %v976_v32, %v667_v61  ;;  %979 = vrsqrt.f32 %v2190_v1  ;;  %907 = vst.msk [vmem:[%s2279_s3 + $0xf0] sm:$0xff] %vm812_vm1, %v875_v35  ;;  %vm2222_vm12 = vmor %vm692_vm10, %vm693_vm11 }
 0x15b   :  { %v738_v40 = vmul.f32 %v625_v4, %v1459_v42  ;;  %v690_v30 = vsub.f32 1.5, %v689_v52  ;;  %v360_v20 = vmul.f32 0.16666667, %v322_v56  ;;  %v873_v13 = vmul.f32 0.2, %v322_v56 }
 0x15c   :  { %804 = vst.msk [vmem:[%s2280_s1 + $0xc0] sm:$0xff] %vm43_vm0, %v772_v53  ;;  %v669_v60 = vmul.f32 0.5, %v668_v47  ;;  %v363_v28 = vmul.f32 0.16666667, %v331_v21  ;;  %v876_v34 = vmul.f32 0.2, %v331_v21  ;;  %vm672_vm13 = vweird.f32 %v2133_v18 }
 0x15d   :  { %v770_v7 = vmin.f32 %v738_v40, 5.0  ;;  %v691_v12 = vmul.f32 %v2161_v50, %v690_v30  ;;  %v392_v38 = vadd.f32 1e-05, %v360_v20  ;;  %905 = vst.msk [vmem:[%s2279_s3 + $0xe0] sm:$0xff] %vm812_vm1, %v873_v13  ;;  %vm673_vm14 = vweird.f32 %v976_v32 }
 0x15e   :  { %v670_v42 = vsub.f32 1.5, %v669_v60  ;;  %v395_v57 = vadd.f32 1e-05, %v363_v28  ;;  %908 = vst.msk [vmem:[%s2279_s3 + $0xf8] sm:$0xff] %vm812_vm1, %v876_v34  ;;  %vm674_vm15 = vmor %vm672_vm13, %vm673_vm14  ;;  %vm702_vm2 = vweird.f32 %v2190_v1  ;;  %vm652_vm4 = vweird.f32 %v2184_v22 }
 0x15f   :  { %v978_v27 = vpop.eup %977  ;;  %802 = vst.msk [vmem:[%s2280_s1 + $0xb0] sm:$0xff] %vm43_vm0, %v770_v7  ;;  %v695_v14 = vsel %vm2222_vm12, %v2161_v50, %v691_v12  ;;  %981 = vrsqrt.f32 %v392_v38  ;;  %vm682_vm8 = vweird.f32 %v392_v38 }
 0x160   :  { %v980_v41 = vpop.eup %979  ;;  %v745_v18 = vmul.f32 %v695_v14, %v1499_v8  ;;  %v671_v56 = vmul.f32 %v976_v32, %v670_v42  ;;  %v647_v29 = vmul.f32 %v978_v27, %v2184_v22  ;;  %983 = vrsqrt.f32 %v395_v57 }
 0x161   :  { %v697_v24 = vmul.f32 %v980_v41, %v2190_v1  ;;  %vm653_vm1 = vweird.f32 %v978_v27  ;;  %vm703_vm3 = vweird.f32 %v980_v41  ;;  %vm712_vm11 = vweird.f32 %v395_v57 }
 0x162   :  { %v777_v49 = vmin.f32 %v745_v18, 5.0  ;;  %v675_v33 = vsel %vm674_vm15, %v976_v32, %v671_v56  ;;  %v648_v58 = vmul.f32 %v978_v27, %v647_v29  ;;  %vm654_vm5 = vmor %vm652_vm4, %vm653_vm1 }
 0x163   :  { %v743_v55 = vmul.f32 %v675_v33, %v1506_v45  ;;  %v698_v2 = vmul.f32 %v980_v41, %v697_v24  ;;  %vm704_vm6 = vmor %vm702_vm2, %vm703_vm3 }
 0x164   :  { %809 = vst.msk [vmem:[%s2280_s1 + $0xe8] sm:$0xff] %vm43_vm0, %v777_v49  ;;  %v649_v17 = vmul.f32 0.5, %v648_v58 }
 0x165   :  { %v982_v8 = vpop.eup %981  ;;  %v775_v19 = vmin.f32 %v743_v55, 5.0  ;;  %v699_v43 = vmul.f32 0.5, %v698_v2 }
 0x166   :  { %v650_v15 = vsub.f32 1.5, %v649_v17  ;;  %v677_v59 = vmul.f32 %v982_v8, %v392_v38  ;;  %v984_v37 = vpop.eup %983  ;;  %vm683_vm7 = vweird.f32 %v982_v8 }
 0x167   :  { %807 = vst.msk [vmem:[%s2280_s1 + $0xd8] sm:$0xff] %vm43_vm0, %v775_v19  ;;  %v700_v45 = vsub.f32 1.5, %v699_v43  ;;  %v707_v50 = vmul.f32 %v984_v37, %v395_v57  ;;  %vm713_vm9 = vweird.f32 %v984_v37  ;;  %vm684_vm10 = vmor %vm682_vm8, %vm683_vm7 }
 0x168   :  { %v651_v6 = vmul.f32 %v978_v27, %v650_v15  ;;  %v678_v46 = vmul.f32 %v982_v8, %v677_v59  ;;  %vm714_vm12 = vmor %vm712_vm11, %vm713_vm9 }
 0x169   :  { %v701_v51 = vmul.f32 %v980_v41, %v700_v45  ;;  %v708_v25 = vmul.f32 %v984_v37, %v707_v50 }
 0x16a   :  { %v655_v63 = vsel %vm654_vm5, %v978_v27, %v651_v6  ;;  %v679_v9 = vmul.f32 0.5, %v678_v46 }
 0x16b   :  { %v741_v36 = vmul.f32 %v655_v63, %v1489_v48  ;;  %v705_v62 = vsel %vm704_vm6, %v980_v41, %v701_v51  ;;  %v709_v26 = vmul.f32 0.5, %v708_v25 }
 0x16c   :  { %v746_v16 = vmul.f32 %v705_v62, %v1533_v44  ;;  %v680_v11 = vsub.f32 1.5, %v679_v9 }
 0x16d   :  { %v773_v1 = vmin.f32 %v741_v36, 5.0  ;;  %v710_v5 = vsub.f32 1.5, %v709_v26 }
 0x16e   :  { %v778_v32 = vmin.f32 %v746_v16, 5.0  ;;  %v681_v22 = vmul.f32 %v982_v8, %v680_v11 }
 0x16f   :  { %805 = vst.msk [vmem:[%s2280_s1 + $0xc8] sm:$0xff] %vm43_vm0, %v773_v1  ;;  %v711_v44 = vmul.f32 %v984_v37, %v710_v5 }
 0x170   :  { %810 = vst.msk [vmem:[%s2280_s1 + $0xf0] sm:$0xff] %vm43_vm0, %v778_v32  ;;  %v685_v48 = vsel %vm684_vm10, %v982_v8, %v681_v22 }
 0x171   :  { %v744_v10 = vmul.f32 %v685_v48, %v1519_v54  ;;  %v715_v31 = vsel %vm714_vm12, %v984_v37, %v711_v44 }
 0x172   :  { %v747_v39 = vmul.f32 %v715_v31, %v1540_v3 }
 0x173   :  { %v776_v35 = vmin.f32 %v744_v10, 5.0 }
 0x174   :  { %v779_v23 = vmin.f32 %v747_v39, 5.0 }
 0x175   :  { %808 = vst.msk [vmem:[%s2280_s1 + $0xe0] sm:$0xff] %vm43_vm0, %v776_v35 }
 0x176   :  { %811 = vst.msk [vmem:[%s2280_s1 + $0xf8] sm:$0xff] %vm43_vm0, %v779_v23 }

</bundles_post_ra>
